<compile_context>
chip_gen: v7x
topology: tpu7x:2x2x1
jax: 0.10.0
libtpu: 0.0.40
codegen_flags: <defaults>
</compile_context>

<pallas_src>
import functools

import numpy as np
import jax
import jax.numpy as jnp
from jax.experimental import pallas as pl
from jax.experimental.pallas import tpu as pltpu

_EPS = 1e-5


def _round_up(v, m):
    return (v + m - 1) // m * m


# ----------------------------------------------------------------------- kernels

def _gf_core_kernel(x_ref, ffwd_ref, winv_ref, wc_ref, y_ref, sum_ref, sq_ref):
    """Folded pre-norm + rfft + complex filter + irfft + post-norm partial sums."""
    M, T = x_ref.shape                 # M = Bt * C, x already in the matmul dtype
    Tp = y_ref.shape[1]
    K2 = ffwd_ref.shape[1]             # 2 * Kp  (Kp = 128-padded rfft length)
    Kp = K2 // 2
    C = wc_ref.shape[1]
    Bt = M // C

    # ---- fused rfft(norm='ortho'): single (M, T) @ (T, 2Kp) MXU matmul ----
    # Columns [0,K) hold Re(rfft(x)), [Kp,Kp+K) hold Im(rfft(x)).  The pre-BN
    # affine is folded into wc_ref on the host, so raw x feeds the MXU directly.
    xf = jnp.dot(x_ref[...], ffwd_ref[...],
                 preferred_element_type=jnp.float32)          # (M, 2Kp) f32

    # ---- per-channel complex filter multiply (kept in f32) ----
    # Rolling by Kp swaps the halves on the XLU: [Re|Im] -> [Im|Re]; with
    #   wa = pre_scale * [wr|wr],  wb = pre_scale * [-wi|wi],
    #   dcf = pre_shift*sqrt(T)*[wr0 .. | wi0 ..]  (DC column only)
    # this yields yf = pre_scale*[Re*wr - Im*wi | Im*wr + Re*wi] + DC-shift term.
    xsw = pltpu.roll(xf, Kp, 1)
    w = wc_ref[...]                                           # (3, C, 2Kp) f32
    yf = (xf.reshape(Bt, C, K2) * w[0:1]
          + xsw.reshape(Bt, C, K2) * w[1:2]
          + w[2:3])                                           # (Bt, C, 2Kp) f32

    # ---- fused irfft(norm='ortho', n=T): single (M, 2Kp) @ (2Kp, Tp) matmul ----
    y2 = jnp.dot(yf.reshape(M, K2).astype(winv_ref.dtype), winv_ref[...],
                 preferred_element_type=jnp.float32)          # (M, Tp); cols T..Tp are 0
    y_ref[...] = y2.astype(y_ref.dtype)                       # lane-dense (Tp % 128 == 0)

    # ---- per-channel partial sums for the post-BatchNorm stats, in f32 BEFORE
    #      the (possibly bf16) handoff store; padded columns are exactly zero ----
    y3 = y2.reshape(Bt, C, Tp)
    s = jnp.sum(jnp.sum(y3, axis=2), axis=0, keepdims=True)           # (1, C)
    q = jnp.sum(jnp.sum(y3 * y3, axis=2), axis=0, keepdims=True)      # (1, C)
    sum_ref[...] = s.reshape(1, 1, C)
    sq_ref[...] = q.reshape(1, 1, C)


def _postnorm_kernel(y_ref, post_ref, o_ref):
    """Post-BatchNorm affine (per-row, already tiled over the batch tile) + un-pad."""
    T = o_ref.shape[1]
    aff = post_ref[...]                                       # (2, Bt*C, 1): [scale, shift]
    o_ref[...] = y_ref[:, :T].astype(jnp.float32) * aff[0] + aff[1]


# --------------------------------------------------------------- host-side helpers

def _fused_dft_matrices(T, Tp, Kp, dtype):
    """Real rfft / irfft (norm='ortho') as one fused forward and one fused inverse
    matrix, zero-padded so the Re/Im halves sit on 128-lane boundaries.

    forward (T, 2Kp):  cols [0,K)  -> Re(rfft),   cols [Kp,Kp+K) -> Im(rfft)
    inverse (2Kp, Tp): rows [0,K)  -> Re weights, rows [Kp,Kp+K) -> Im weights
    (Hermitian inverse; imaginary parts of DC/Nyquist bins ignored, as torch does.)
    """
    K = T // 2 + 1
    scale = 1.0 / np.sqrt(T)
    n = np.arange(T)[:, None].astype(np.float64)
    k = np.arange(K)[None, :].astype(np.float64)
    ang = 2.0 * np.pi * n * k / T                             # (T, K)

    fwd = np.zeros((T, 2 * Kp), np.float64)
    fwd[:, :K] = np.cos(ang) * scale
    fwd[:, Kp:Kp + K] = -np.sin(ang) * scale

    c = np.full((K,), 2.0)
    d = np.full((K,), 2.0)
    c[0], d[0] = 1.0, 0.0
    if T % 2 == 0:
        c[-1], d[-1] = 1.0, 0.0
    inv = np.zeros((2 * Kp, Tp), np.float64)
    inv[:K, :T] = c[:, None] * np.cos(ang.T) * scale
    inv[Kp:Kp + K, :T] = -d[:, None] * np.sin(ang.T) * scale
    return jnp.asarray(fwd, dtype), jnp.asarray(inv, dtype)


def _interp_weight(w, K):
    """F.interpolate(..., mode='linear', align_corners=True) along the freq axis."""
    Kw = w.shape[1]
    if Kw == K:
        return w
    if K == 1:
        pos = jnp.zeros((1,), jnp.float32)
    else:
        pos = jnp.arange(K, dtype=jnp.float32) * ((Kw - 1) / (K - 1))
    lo = jnp.floor(pos).astype(jnp.int32)
    hi = jnp.minimum(lo + 1, Kw - 1)
    frac = (pos - lo.astype(jnp.float32))[None, :, None]
    return w[:, lo, :] * (1.0 - frac) + w[:, hi, :] * frac


@functools.lru_cache(maxsize=None)
def _chip_params():
    """Per-generation VMEM budget / caps and megacore split preference."""
    kind = ""
    try:
        kind = (jax.devices()[0].device_kind or "").lower()
    except Exception:
        pass
    if "v7" in kind:
        # 64 MiB physical VMEM per TensorCore, 2 TCs/chip: keep tiles small enough
        # that the parallel batch axis splits across both cores (nb >= 2).
        return {"hard_cap": 56 << 20, "budget": 24 << 20, "split": True, "min_m": 256}
    if "v5 lite" in kind or "v5e" in kind:
        return {"hard_cap": 100 << 20, "budget": 48 << 20, "split": False, "min_m": 128}
    # v6e (and default): 128 MiB physical VMEM, single TensorCore.
    return {"hard_cap": 100 << 20, "budget": 48 << 20, "split": False, "min_m": 256}


@functools.lru_cache(maxsize=None)
def _single_buffer_supported():
    """Probe once whether BlockSpec(pipeline_mode=pl.Buffered(1)) lowers & runs here.

    Single-buffering the grid-invariant operands (DFT matrices, filter coeffs)
    halves their fixed VMEM footprint; fall back silently if unsupported.
    """
    if not hasattr(pl, "Buffered"):
        return False
    try:
        def _probe_kernel(c_ref, x_ref, o_ref):
            o_ref[...] = x_ref[...] + c_ref[...]

        with jax.ensure_compile_time_eval():
            f = pl.pallas_call(
                _probe_kernel,
                out_shape=jax.ShapeDtypeStruct((16, 128), jnp.float32),
                grid=(2,),
                in_specs=[pl.BlockSpec((8, 128), lambda i: (0, 0),
                                       pipeline_mode=pl.Buffered(1)),
                          pl.BlockSpec((8, 128), lambda i: (i, 0))],
                out_specs=pl.BlockSpec((8, 128), lambda i: (i, 0)))
            jax.block_until_ready(f(jnp.ones((8, 128), jnp.float32),
                                    jnp.ones((16, 128), jnp.float32)))
        return True
    except Exception:
        return False


def _plan_tiles(B, C, T, Tp, K2, in_it, inter_it, mm_it, single_buffer,
                budget, hard_cap, split, min_m, batch_tile=None):
    """Pick the batch tile and a matching scoped-VMEM limit from an explicit model.

    Model (bytes): double-buffered x/y blocks + single/double-buffered constants
    (DFT matrices, filter coeffs) + in-kernel f32 temporaries (xf, xsw, yf, cast,
    y2) + slack.
    """
    buf = 1 if single_buffer else 2
    fixed = buf * (T * K2 * mm_it + K2 * Tp * mm_it + 3 * C * K2 * 4) + (1 << 20)
    per_b = C * (2 * T * in_it            # x block, double buffered
                 + 2 * Tp * inter_it      # y block, double buffered
                 + K2 * (3 * 4 + mm_it)   # xf, xsw, yf (f32) + bf16 cast of yf
                 + Tp * 4                 # y2 (f32) before the handoff cast
                 + T * in_it)             # headroom for layout copies

    def est(bt):
        return fixed + bt * per_b

    if batch_tile is not None:
        bt = batch_tile
    else:
        divs = [d for d in range(1, B + 1)
                if B % d == 0 and ((d * C) % 8 == 0 or d == B)]
        if split and B >= 2:
            small = [d for d in divs if d <= B // 2]
            divs = small or divs
        fit = [d for d in divs if est(d) <= budget]
        bt = max(fit) if fit else min(divs)
        if bt * C < min_m:
            # Fill the MXU M dimension even if it means exceeding the soft budget
            # (but stay well under the physical cap).
            bigger = [d for d in divs if d > bt and est(d) <= int(hard_cap * 0.85)]
            reach = [d for d in bigger if d * C >= min_m]
            if reach:
                bt = min(reach)
            elif bigger:
                bt = max(bigger)
    vmem_limit = int(min(hard_cap, max(32 << 20, int(est(bt) * 1.5) + (2 << 20))))
    return bt, vmem_limit


# ---------------------------------------------------------------------- forward

def global_filter_1d(x, complex_weight, bn_params, *, batch_tile=None,
                     matmul_dtype=jnp.bfloat16, vmem_budget_bytes=None,
                     single_buffer_constants=None):
    """x: (B, C, T) float; complex_weight: (C, K_w, 2);
    bn_params: (4, C, 1) stacked [pre_gamma, pre_beta, post_gamma, post_beta]."""
    B, C, T = x.shape
    K = T // 2 + 1
    Tp = _round_up(T, 128)            # lane-dense intermediate width
    Kp = _round_up(K, 128)            # Re/Im halves land on vreg boundaries
    K2 = 2 * Kp
    mm_dt = jnp.dtype(matmul_dtype)

    chip = _chip_params()
    if single_buffer_constants is None:
        single_buffer_constants = _single_buffer_supported()
    budget = chip["budget"] if vmem_budget_bytes is None else vmem_budget_bytes

    x32 = x.astype(jnp.float32)
    g1 = bn_params[0, :, 0].astype(jnp.float32)
    b1 = bn_params[1, :, 0].astype(jnp.float32)
    g2 = bn_params[2, :, 0].astype(jnp.float32)
    b2 = bn_params[3, :, 0].astype(jnp.float32)

    # ---- pre BatchNorm1d stats (train-mode, biased): single plain-JAX sweep.
    # E[x^2]-mean^2 in f32 is fine for typical activations; a two-pass form is
    # safer for inputs with very large means.
    n = B * T
    s1 = jnp.sum(x32, axis=(0, 2))
    q1 = jnp.sum(x32 * x32, axis=(0, 2))
    mean1 = s1 / n
    rstd1 = jax.lax.rsqrt(q1 / n - mean1 * mean1 + _EPS)
    pre_scale = g1 * rstd1
    pre_shift = b1 - mean1 * pre_scale
    # The cast/flatten of x for the MXU fuses into the same HBM sweep as the stats.
    x_mm = (x32 if mm_dt == jnp.dtype(jnp.float32)
            else x32.astype(matmul_dtype)).reshape(B * C, T)

    # ---- filter weights: PyTorch compares weight.shape[2] (==2) against K, i.e.
    # it interpolates for any K != 2; the interpolation is an identity when the
    # frequency axes already match, so a shape-correct `K_w != K` check is
    # equivalent for all non-degenerate cases.
    w = complex_weight.astype(jnp.float32)
    if w.shape[1] != K:
        w = _interp_weight(w, K)
    wr = jnp.pad(w[..., 0], ((0, 0), (0, Kp - K)))             # (C, Kp)
    wi = jnp.pad(w[..., 1], ((0, 0), (0, Kp - K)))
    # Fold the whole pre-BN affine into the filter operand:
    #   scale -> multiplies the complex weight per channel,
    #   shift -> rfft of a constant only hits the DC bin (value shift*sqrt(T)),
    #            so it becomes an additive per-channel DC column (dcf).
    wa = pre_scale[:, None] * jnp.concatenate([wr, wr], axis=1)        # (C, 2Kp)
    wb = pre_scale[:, None] * jnp.concatenate([-wi, wi], axis=1)
    sqrt_t = float(np.sqrt(T))
    dcf = jnp.zeros((C, K2), jnp.float32)
    dcf = dcf.at[:, 0].set(pre_shift * sqrt_t * wr[:, 0])
    dcf = dcf.at[:, Kp].set(pre_shift * sqrt_t * wi[:, 0])   # Im(DC): dropped by irfft
    wcoef = jnp.stack([wa, wb, dcf], axis=0)                           # (3, C, 2Kp)

    f_fwd, w_inv = _fused_dft_matrices(T, Tp, Kp, matmul_dtype)

    inter_dtype = matmul_dtype        # bf16 y_pad handoff on the fast path
    in_it = mm_dt.itemsize
    inter_it = jnp.dtype(inter_dtype).itemsize

    bt, vmem_limit = _plan_tiles(B, C, T, Tp, K2, in_it, inter_it, mm_dt.itemsize,
                                 single_buffer_constants, budget,
                                 chip["hard_cap"], chip["split"], chip["min_m"],
                                 batch_tile=batch_tile)
    if B % bt != 0:
        raise ValueError(f"batch_tile={bt} must divide B={B}")
    if (bt * C) % 8 != 0 and bt != B:
        raise ValueError(f"batch_tile*C={bt * C} must be a multiple of 8 (or bt == B)")
    nb = B // bt

    def _const_spec(shape):
        # Grid-invariant operands: single-buffered when supported (halves their
        # fixed VMEM footprint), double-buffered otherwise.
        if single_buffer_constants:
            return pl.BlockSpec(shape, lambda *_: (0,) * len(shape),
                                pipeline_mode=pl.Buffered(1))
        return pl.BlockSpec(shape, lambda *_: (0,) * len(shape))

    cparams = pltpu.CompilerParams(dimension_semantics=("parallel",),
                                   vmem_limit_bytes=vmem_limit)
    flops = 2 * B * C * K2 * (T + Tp)                  # two fused DFT matmuls
    bytes_accessed = (B * C * T * in_it + B * C * Tp * inter_it
                      + (T * K2 + K2 * Tp) * mm_dt.itemsize
                      + 3 * C * K2 * 4 + 2 * nb * C * 4)
    cost = pl.CostEstimate(flops=flops, transcendentals=0,
                           bytes_accessed=bytes_accessed)

    # ---- main kernel: fused rfft / filter (+ folded pre-norm) / irfft + stats ----
    y_pad, ps_sum, ps_sq = pl.pallas_call(
        _gf_core_kernel,
        out_shape=(jax.ShapeDtypeStruct((B * C, Tp), inter_dtype),
                   jax.ShapeDtypeStruct((nb, 1, C), jnp.float32),
                   jax.ShapeDtypeStruct((nb, 1, C), jnp.float32)),
        grid=(nb,),
        in_specs=[
            pl.BlockSpec((bt * C, T), lambda i: (i, 0)),
            _const_spec((T, K2)),
            _const_spec((K2, Tp)),
            _const_spec((3, C, K2)),
        ],
        out_specs=(pl.BlockSpec((bt * C, Tp), lambda i: (i, 0)),
                   pl.BlockSpec((1, 1, C), lambda i: (i, 0, 0)),
                   pl.BlockSpec((1, 1, C), lambda i: (i, 0, 0))),
        compiler_params=cparams,
        cost_estimate=cost,
    )(x_mm, f_fwd, w_inv, wcoef)

    # ---- post BatchNorm1d stats from the per-tile f32 partial sums ----
    s2 = jnp.sum(ps_sum[:, 0, :], axis=0)
    q2 = jnp.sum(ps_sq[:, 0, :], axis=0)
    mean2 = s2 / n
    rstd2 = jax.lax.rsqrt(q2 / n - mean2 * mean2 + _EPS)
    post_scale = g2 * rstd2
    post_shift = b2 - mean2 * post_scale
    # Tile the per-channel affine to per-row (rows are (b_local, c) with c fastest)
    # so the epilogue needs no packed-dtype reshape.
    post_aff = jnp.stack([jnp.tile(post_scale, bt),
                          jnp.tile(post_shift, bt)], axis=0)[:, :, None]  # (2, bt*C, 1)

    # ---- epilogue: post-norm affine + un-pad back to T.  If T % 128 != 0 the
    # final store is a masked vst on the last partial vreg; with T == Tp and an
    # f32 handoff the y_pad buffer could additionally be aliased into the output.
    out2d = pl.pallas_call(
        _postnorm_kernel,
        out_shape=jax.ShapeDtypeStruct((B * C, T), jnp.float32),
        grid=(nb,),
        in_specs=[pl.BlockSpec((bt * C, Tp), lambda i: (i, 0)),
                  _const_spec((2, bt * C, 1))],
        out_specs=pl.BlockSpec((bt * C, T), lambda i: (i, 0)),
        compiler_params=cparams,
    )(y_pad, post_aff)
    return out2d.reshape(B, C, T)


# --------------------------------------------------------------------- reference

def _interp_np(w, K):
    Kw = w.shape[1]
    if Kw == K:
        return w
    pos = (np.arange(K) * ((Kw - 1) / (K - 1))) if K > 1 else np.zeros((1,))
    lo = np.floor(pos).astype(np.int64)
    hi = np.minimum(lo + 1, Kw - 1)
    frac = (pos - lo)[None, :, None]
    return w[:, lo, :] * (1.0 - frac) + w[:, hi, :] * frac


def _reference_numpy(x, complex_weight, bn_params, eps=_EPS):
    """Pure numpy (float64) reference of the PyTorch forward (train-mode BatchNorm)."""
    x = np.asarray(x, np.float64)
    w = np.asarray(complex_weight, np.float64)
    bn = np.asarray(bn_params, np.float64)
    B, C, T = x.shape
    K = T // 2 + 1
    g1, b1, g2, b2 = bn[0, :, 0], bn[1, :, 0], bn[2, :, 0], bn[3, :, 0]

    mean = x.mean(axis=(0, 2), keepdims=True)
    var = ((x - mean) ** 2).mean(axis=(0, 2), keepdims=True)
    xn = (x - mean) / np.sqrt(var + eps) * g1[None, :, None] + b1[None, :, None]
    X = np.fft.rfft(xn, axis=-1, norm='ortho')
    if w.shape[1] != K:
        w = _interp_np(w, K)
    wc = w[..., 0] + 1j * w[..., 1]
    Y = X * wc[None]
    y = np.fft.irfft(Y, n=T, axis=-1, norm='ortho')
    m2 = y.mean(axis=(0, 2), keepdims=True)
    v2 = ((y - m2) ** 2).mean(axis=(0, 2), keepdims=True)
    return (y - m2) / np.sqrt(v2 + eps) * g2[None, :, None] + b2[None, :, None]


if __name__ == "__main__":
    B, C, T = 2, 8, 16                    # dim=C (multiple of 8); module T == input T
    K = T // 2 + 1

    key = jax.random.PRNGKey(0)
    k_x, k_w, k_w2, k_g1, k_b1, k_g2, k_b2 = jax.random.split(key, 7)
    x = jax.random.normal(k_x, (B, C, T), dtype=jnp.float32)
    # nn.Parameter(randn(dim, T//2+1, 2) * 0.02) then trunc_normal_(std=0.02)
    complex_weight = 0.02 * jax.random.truncated_normal(
        k_w, -2.0, 2.0, (C, K, 2), dtype=jnp.float32)
    # Non-default BatchNorm affines to exercise the folded pre/post affine paths.
    bn_params = jnp.stack([
        1.0 + 0.1 * jax.random.normal(k_g1, (C,)),
        0.1 * jax.random.normal(k_b1, (C,)),
        1.0 + 0.1 * jax.random.normal(k_g2, (C,)),
        0.1 * jax.random.normal(k_b2, (C,)),
    ])[..., None].astype(jnp.float32)
    # TODO(synk): BatchNorm running-mean/var buffer updates (a training side effect)
    # are not modelled; only the train-mode forward output is reproduced.

    single_buf = _single_buffer_supported()   # eager feature probe (cached)

    ref = _reference_numpy(np.asarray(x), np.asarray(complex_weight),
                           np.asarray(bn_params))

    # 1) f32 MXU path with forced batch_tile=1 -> grid=(2,): exercises the batch
    #    tiling and the cross-tile partial-sum post-norm statistics. Tight tolerance.
    f32_fwd = jax.jit(functools.partial(global_filter_1d, batch_tile=1,
                                        matmul_dtype=jnp.float32,
                                        single_buffer_constants=single_buf))
    out_f32 = jax.block_until_ready(f32_fwd(x, complex_weight, bn_params))
    np.testing.assert_allclose(np.asarray(out_f32), ref, rtol=1e-3, atol=1e-3)

    # 2) default fast path: bf16 MXU operands, bf16 y_pad handoff, auto batch tile.
    fast_fwd = jax.jit(functools.partial(global_filter_1d,
                                         single_buffer_constants=single_buf))
    out_fast = jax.block_until_ready(fast_fwd(x, complex_weight, bn_params))
    np.testing.assert_allclose(np.asarray(out_fast), ref, rtol=3e-2, atol=3e-2)

    # 3) frequency-interpolation branch (module built with T_init=8 -> K_w=5 != K=9).
    Kw = 8 // 2 + 1
    complex_weight_small = 0.02 * jax.random.truncated_normal(
        k_w2, -2.0, 2.0, (C, Kw, 2), dtype=jnp.float32)
    ref_i = _reference_numpy(np.asarray(x), np.asarray(complex_weight_small),
                             np.asarray(bn_params))
    interp_fwd = jax.jit(functools.partial(global_filter_1d,
                                           matmul_dtype=jnp.float32,
                                           single_buffer_constants=single_buf))
    out_i = jax.block_until_ready(interp_fwd(x, complex_weight_small, bn_params))
    np.testing.assert_allclose(np.asarray(out_i), ref_i, rtol=2e-3, atol=2e-3)

    print("KERNEL_OK")
</pallas_src>

<mosaic_0001>
module attributes {stable_mosaic.version = 11 : i64} {
  func.func @_probe_kernel(%arg0: i32, %arg1: memref<8x128xf32, #tpu.memory_space<vmem>>, %arg2: memref<8x128xf32, #tpu.memory_space<vmem>>, %arg3: memref<8x128xf32, #tpu.memory_space<vmem>>) attributes {dimension_semantics = [#tpu.dimension_semantics<arbitrary>], iteration_bounds = array<i64: 2>, scalar_prefetch = 0 : i64, scratch_operands = 0 : i64, tpu.core_type = #tpu.core_type<tc>, window_params = [{pipeline_mode = #tpu.pipeline_mode<synchronous>, transform_indices = @transform_0, window_bounds = array<i64: 8, 128>}, {transform_indices = @transform_1, window_bounds = array<i64: 8, 128>}, {transform_indices = @transform_2, window_bounds = array<i64: 8, 128>}]} {
    %c0 = arith.constant 0 : index
    %c0_0 = arith.constant 0 : index
    %0 = vector.load %arg2[%c0, %c0_0] : memref<8x128xf32, #tpu.memory_space<vmem>>, vector<8x128xf32>
    %c0_1 = arith.constant 0 : index
    %c0_2 = arith.constant 0 : index
    %1 = vector.load %arg1[%c0_1, %c0_2] : memref<8x128xf32, #tpu.memory_space<vmem>>, vector<8x128xf32>
    %2 = arith.addf %0, %1 : vector<8x128xf32>
    %c0_3 = arith.constant 0 : index
    %c0_4 = arith.constant 0 : index
    %3 = vector.load %arg3[%c0_3, %c0_4] : memref<8x128xf32, #tpu.memory_space<vmem>>, vector<8x128xf32>
    tpu.vector_store %arg3[%c0_3, %c0_4], %2 {strides = array<i32>} : memref<8x128xf32, #tpu.memory_space<vmem>>, vector<8x128xf32>,
    return
  }
  func.func @transform_0(%arg0: i32) -> (i32, i32) {
    %c0_i32 = arith.constant 0 : i32
    %c0_i32_0 = arith.constant 0 : i32
    %c0_i32_1 = arith.constant 0 : i32
    return %c0_i32, %c0_i32_0 : i32, i32
  }
  func.func @transform_1(%arg0: i32) -> (i32, i32) {
    %c0_i32 = arith.constant 0 : i32
    %c0_i32_0 = arith.constant 0 : i32
    return %arg0, %c0_i32 : i32, i32
  }
  func.func @transform_2(%arg0: i32) -> (i32, i32) {
    %c0_i32 = arith.constant 0 : i32
    %c0_i32_0 = arith.constant 0 : i32
    return %arg0, %c0_i32 : i32, i32
  }
}

module attributes {stable_mosaic.version = 11 : i64} {
  func.func @_postnorm_kernel(%arg0: i32, %arg1: memref<8x128xf32, #tpu.memory_space<vmem>>, %arg2: memref<2x8x1xf32, #tpu.memory_space<vmem>>, %arg3: memref<8x16xf32, #tpu.memory_space<vmem>>) attributes {dimension_semantics = [#tpu.dimension_semantics<parallel>], iteration_bounds = array<i64: 2>, scalar_prefetch = 0 : i64, scratch_operands = 0 : i64, tpu.core_type = #tpu.core_type<tc>, window_params = [{transform_indices = @transform_0, window_bounds = array<i64: 8, 128>}, {pipeline_mode = #tpu.pipeline_mode<synchronous>, transform_indices = @transform_1, window_bounds = array<i64: 2, 8, 1>}, {transform_indices = @transform_2, window_bounds = array<i64: 8, 16>}]} {
    %c0 = arith.constant 0 : index
    %c0_0 = arith.constant 0 : index
    %c0_1 = arith.constant 0 : index
    %0 = vector.load %arg2[%c0, %c0_0, %c0_1] : memref<2x8x1xf32, #tpu.memory_space<vmem>>, vector<2x8x1xf32>
    %c0_2 = arith.constant 0 : index
    %c0_3 = arith.constant 0 : index
    %1 = vector.load %arg1[%c0_2, %c0_3] : memref<8x128xf32, #tpu.memory_space<vmem>>, vector<8x16xf32>
    %2 = vector.extract_strided_slice %0 {offsets = [0, 0, 0], sizes = [1, 8, 1], strides = [1, 1, 1]} : vector<2x8x1xf32> to vector<1x8x1xf32>
    %3 = vector.shape_cast %2 : vector<1x8x1xf32> to vector<8x1xf32>
    %4 = vector.broadcast %3 : vector<8x1xf32> to vector<8x16xf32>
    %5 = arith.mulf %1, %4 : vector<8x16xf32>
    %6 = vector.extract_strided_slice %0 {offsets = [1, 0, 0], sizes = [1, 8, 1], strides = [1, 1, 1]} : vector<2x8x1xf32> to vector<1x8x1xf32>
    %7 = vector.shape_cast %6 : vector<1x8x1xf32> to vector<8x1xf32>
    %8 = vector.broadcast %7 : vector<8x1xf32> to vector<8x16xf32>
    %9 = arith.addf %5, %8 : vector<8x16xf32>
    %c0_4 = arith.constant 0 : index
    %c0_5 = arith.constant 0 : index
    %10 = vector.load %arg3[%c0_4, %c0_5] : memref<8x16xf32, #tpu.memory_space<vmem>>, vector<8x16xf32>
    tpu.vector_store %arg3[%c0_4, %c0_5], %9 {strides = array<i32>} : memref<8x16xf32, #tpu.memory_space<vmem>>, vector<8x16xf32>,
    return
  }
  func.func @transform_0(%arg0: i32) -> (i32, i32) {
    %c0_i32 = arith.constant 0 : i32
    %c0_i32_0 = arith.constant 0 : i32
    return %arg0, %c0_i32 : i32, i32
  }
  func.func @transform_1(%arg0: i32) -> (i32, i32, i32) {
    %c0_i32 = arith.constant 0 : i32
    %c0_i32_0 = arith.constant 0 : i32
    %c0_i32_1 = arith.constant 0 : i32
    %c0_i32_2 = arith.constant 0 : i32
    return %c0_i32, %c0_i32_0, %c0_i32_1 : i32, i32, i32
  }
  func.func @transform_2(%arg0: i32) -> (i32, i32) {
    %c0_i32 = arith.constant 0 : i32
    %c0_i32_0 = arith.constant 0 : i32
    return %arg0, %c0_i32 : i32, i32
  }
}

module attributes {stable_mosaic.version = 11 : i64} {
  func.func @_gf_core_kernel(%arg0: i32, %arg1: memref<8x16xf32, #tpu.memory_space<vmem>>, %arg2: memref<16x256xf32, #tpu.memory_space<vmem>>, %arg3: memref<256x128xf32, #tpu.memory_space<vmem>>, %arg4: memref<3x8x256xf32, #tpu.memory_space<vmem>>, %arg5: memref<8x128xf32, #tpu.memory_space<vmem>>, %arg6: memref<1x1x8xf32, #tpu.memory_space<vmem>>, %arg7: memref<1x1x8xf32, #tpu.memory_space<vmem>>) attributes {dimension_semantics = [#tpu.dimension_semantics<parallel>], iteration_bounds = array<i64: 2>, scalar_prefetch = 0 : i64, scratch_operands = 0 : i64, tpu.core_type = #tpu.core_type<tc>, window_params = [{transform_indices = @transform_0, window_bounds = array<i64: 8, 16>}, {pipeline_mode = #tpu.pipeline_mode<synchronous>, transform_indices = @transform_1, window_bounds = array<i64: 16, 256>}, {pipeline_mode = #tpu.pipeline_mode<synchronous>, transform_indices = @transform_2, window_bounds = array<i64: 256, 128>}, {pipeline_mode = #tpu.pipeline_mode<synchronous>, transform_indices = @transform_3, window_bounds = array<i64: 3, 8, 256>}, {transform_indices = @transform_4, window_bounds = array<i64: 8, 128>}, {transform_indices = @transform_5, window_bounds = array<i64: 1, 1, 8>}, {transform_indices = @transform_6, window_bounds = array<i64: 1, 1, 8>}]} {
    %c0 = arith.constant 0 : index
    %c0_0 = arith.constant 0 : index
    %0 = vector.load %arg1[%c0, %c0_0] : memref<8x16xf32, #tpu.memory_space<vmem>>, vector<8x16xf32>
    %c0_1 = arith.constant 0 : index
    %c0_2 = arith.constant 0 : index
    %1 = vector.load %arg2[%c0_1, %c0_2] : memref<16x256xf32, #tpu.memory_space<vmem>>, vector<16x256xf32>
    %cst = arith.constant dense<0.000000e+00> : vector<8x256xf32>
    %2 = tpu.matmul %0, %1, %cst {dimension_numbers = #tpu.dot_dimension_numbers<[1], [0], [0], [1], [0, 0, 1, 1], [], []>} : vector<8x16xf32>, vector<16x256xf32>, vector<8x256xf32> -> vector<8x256xf32>
    %c128_i32 = arith.constant 128 : i32
    %3 = tpu.dynamic_rotate %2 by %c128_i32 dim 1 : vector<8x256xf32>, i32 -> vector<8x256xf32>
    %c0_3 = arith.constant 0 : index
    %c0_4 = arith.constant 0 : index
    %c0_5 = arith.constant 0 : index
    %4 = vector.load %arg4[%c0_3, %c0_4, %c0_5] : memref<3x8x256xf32, #tpu.memory_space<vmem>>, vector<3x8x256xf32>
    %5 = vector.shape_cast %2 : vector<8x256xf32> to vector<1x8x256xf32>
    %6 = vector.extract_strided_slice %4 {offsets = [0, 0, 0], sizes = [1, 8, 256], strides = [1, 1, 1]} : vector<3x8x256xf32> to vector<1x8x256xf32>
    %7 = arith.mulf %5, %6 : vector<1x8x256xf32>
    %8 = vector.shape_cast %3 : vector<8x256xf32> to vector<1x8x256xf32>
    %9 = vector.extract_strided_slice %4 {offsets = [1, 0, 0], sizes = [1, 8, 256], strides = [1, 1, 1]} : vector<3x8x256xf32> to vector<1x8x256xf32>
    %10 = arith.mulf %8, %9 : vector<1x8x256xf32>
    %11 = arith.addf %7, %10 : vector<1x8x256xf32>
    %12 = vector.extract_strided_slice %4 {offsets = [2, 0, 0], sizes = [1, 8, 256], strides = [1, 1, 1]} : vector<3x8x256xf32> to vector<1x8x256xf32>
    %13 = arith.addf %11, %12 : vector<1x8x256xf32>
    %14 = vector.shape_cast %13 : vector<1x8x256xf32> to vector<8x256xf32>
    %c0_6 = arith.constant 0 : index
    %c0_7 = arith.constant 0 : index
    %15 = vector.load %arg3[%c0_6, %c0_7] : memref<256x128xf32, #tpu.memory_space<vmem>>, vector<256x128xf32>
    %cst_8 = arith.constant dense<0.000000e+00> : vector<8x128xf32>
    %16 = tpu.matmul %14, %15, %cst_8 {dimension_numbers = #tpu.dot_dimension_numbers<[1], [0], [0], [1], [0, 0, 1, 1], [], []>} : vector<8x256xf32>, vector<256x128xf32>, vector<8x128xf32> -> vector<8x128xf32>
    %c0_9 = arith.constant 0 : index
    %c0_10 = arith.constant 0 : index
    %17 = vector.load %arg5[%c0_9, %c0_10] : memref<8x128xf32, #tpu.memory_space<vmem>>, vector<8x128xf32>
    tpu.vector_store %arg5[%c0_9, %c0_10], %16 {strides = array<i32>} : memref<8x128xf32, #tpu.memory_space<vmem>>, vector<8x128xf32>,
    %18 = vector.shape_cast %16 : vector<8x128xf32> to vector<1x8x128xf32>
    %cst_11 = arith.constant dense<0.000000e+00> : vector<1x8xf32>
    %19 = vector.multi_reduction <add>, %18, %cst_11 [2] : vector<1x8x128xf32> to vector<1x8xf32>
    %cst_12 = arith.constant dense<0.000000e+00> : vector<8xf32>
    %20 = vector.multi_reduction <add>, %19, %cst_12 [0] : vector<1x8xf32> to vector<8xf32>
    %21 = vector.shape_cast %20 : vector<8xf32> to vector<1x8xf32>
    %22 = arith.mulf %18, %18 : vector<1x8x128xf32>
    %cst_13 = arith.constant dense<0.000000e+00> : vector<1x8xf32>
    %23 = vector.multi_reduction <add>, %22, %cst_13 [2] : vector<1x8x128xf32> to vector<1x8xf32>
    %cst_14 = arith.constant dense<0.000000e+00> : vector<8xf32>
    %24 = vector.multi_reduction <add>, %23, %cst_14 [0] : vector<1x8xf32> to vector<8xf32>
    %25 = vector.shape_cast %24 : vector<8xf32> to vector<1x8xf32>
    %26 = vector.shape_cast %21 : vector<1x8xf32> to vector<1x1x8xf32>
    %c0_15 = arith.constant 0 : index
    %c0_16 = arith.constant 0 : index
    %c0_17 = arith.constant 0 : index
    %27 = vector.load %arg6[%c0_15, %c0_16, %c0_17] : memref<1x1x8xf32, #tpu.memory_space<vmem>>, vector<1x1x8xf32>
    tpu.vector_store %arg6[%c0_15, %c0_16, %c0_17], %26 {strides = array<i32>} : memref<1x1x8xf32, #tpu.memory_space<vmem>>, vector<1x1x8xf32>,
    %28 = vector.shape_cast %25 : vector<1x8xf32> to vector<1x1x8xf32>
    %c0_18 = arith.constant 0 : index
    %c0_19 = arith.constant 0 : index
    %c0_20 = arith.constant 0 : index
    %29 = vector.load %arg7[%c0_18, %c0_19, %c0_20] : memref<1x1x8xf32, #tpu.memory_space<vmem>>, vector<1x1x8xf32>
    tpu.vector_store %arg7[%c0_18, %c0_19, %c0_20], %28 {strides = array<i32>} : memref<1x1x8xf32, #tpu.memory_space<vmem>>, vector<1x1x8xf32>,
    return
  }
  func.func @transform_0(%arg0: i32) -> (i32, i32) {
    %c0_i32 = arith.constant 0 : i32
    %c0_i32_0 = arith.constant 0 : i32
    return %arg0, %c0_i32 : i32, i32
  }
  func.func @transform_1(%arg0: i32) -> (i32, i32) {
    %c0_i32 = arith.constant 0 : i32
    %c0_i32_0 = arith.constant 0 : i32
    %c0_i32_1 = arith.constant 0 : i32
    return %c0_i32, %c0_i32_0 : i32, i32
  }
  func.func @transform_2(%arg0: i32) -> (i32, i32) {
    %c0_i32 = arith.constant 0 : i32
    %c0_i32_0 = arith.constant 0 : i32
    %c0_i32_1 = arith.constant 0 : i32
    return %c0_i32, %c0_i32_0 : i32, i32
  }
  func.func @transform_3(%arg0: i32) -> (i32, i32, i32) {
    %c0_i32 = arith.constant 0 : i32
    %c0_i32_0 = arith.constant 0 : i32
    %c0_i32_1 = arith.constant 0 : i32
    %c0_i32_2 = arith.constant 0 : i32
    return %c0_i32, %c0_i32_0, %c0_i32_1 : i32, i32, i32
  }
  func.func @transform_4(%arg0: i32) -> (i32, i32) {
    %c0_i32 = arith.constant 0 : i32
    %c0_i32_0 = arith.constant 0 : i32
    return %arg0, %c0_i32 : i32, i32
  }
  func.func @transform_5(%arg0: i32) -> (i32, i32, i32) {
    %c0_i32 = arith.constant 0 : i32
    %c0_i32_0 = arith.constant 0 : i32
    %c0_i32_1 = arith.constant 0 : i32
    return %arg0, %c0_i32, %c0_i32_0 : i32, i32, i32
  }
  func.func @transform_6(%arg0: i32) -> (i32, i32, i32) {
    %c0_i32 = arith.constant 0 : i32
    %c0_i32_0 = arith.constant 0 : i32
    %c0_i32_1 = arith.constant 0 : i32
    return %arg0, %c0_i32, %c0_i32_0 : i32, i32, i32
  }
}

</mosaic_0001>

<bundles_post_ra>
// kernel: tpu_custom_call.1
= control target key start
LH: loop header
LB: loop body
LE: loop exit
PB: predicated region body
PF: predicated region fallthrough
CT: control target
= control target key end

     0   :  { %7 = vsyncpa [#allocation3], 0  ;;  %s692_s0 = inlined_call_operand.hbm [shape: f32[8,128], index: 0, kind: input, shape index: {}]   ;;  %s693_s1 = inlined_call_operand.hbm [shape: f32[16,128], index: 1, kind: input, shape index: {}]   ;;  %s694_s2 = inlined_call_operand.hbm [shape: f32[16,128], index: 2, kind: output, shape index: {}]  }
   0x1   :  { %8 = vsyncpa [#allocation6], 0 }
   0x2   :  { %10 = vsyncpa [#allocation6 + $0x1], 0 }
   0x3   :  { %11 = vsyncpa [#allocation4], 0 }
   0x4   :  { %13 = vsyncpa [#allocation4 + $0x1], 0  ;;  %s491_s9 = smov 0   ;;  %s493_s10 = smov 0  }
   0x5   :  { %s495_s11 = smov 0   ;;  %s497_s12 = smov 0  }
   0x6 LB: > { %s512_s13 = sadd.s32 4294967295, %s471_s12   ;;  %s272_s14 = sadd.s32 4294967294, %s471_s12   ;;  %s471_s12 = sphi %s497_s12, %s718_s12   ;;  %s467_s11 = sphi %s495_s11, %s717_s11   ;;  %s463_s10 = sphi %s493_s10, %s716_s10   ;;  %s459_s9 = sphi %s491_s9, %s715_s9  }
   0x7   : > { %p60_p0 = scmp.ne.s32.totalorder %s463_s10, %s459_s9  ;;  %p695_p1 = scmp.eq.s32.totalorder %s512_s13, 0 }
   0x8   : > { %p90_p3 = scmp.eq.s32.totalorder %s272_s14, 1  ;;  %p273_p5 = scmp.ge.s32.totalorder %s471_s12, 1 }
   0x9   : > { %p521_p4 = por %p695_p1, %p60_p0  ;;  %p97_p7 = scmp.lt.s32.totalorder %s471_s12, 3 }
   0xa   : > { %p526_p6 = por %p90_p3, %p60_p0  ;;  %s473_s18 = smov [#allocation2]  }
   0xb   : > { %s698_s15 = scalar_select %p521_p4, 1, 0 }
   0xc   : > { %s699_s16 = scalar_select %p526_p6, 1, 0 }
   0xd   : > { %p531_p8 = pnand %p273_p5, %p97_p7  ;;  %s110_s19 = sshll.u32 %s473_s18, 4  ;;  %s111_s19 = int_to_ptr.vmem [resolvable:$true] %s110_s19 }
   0xe   : > { %s539_s20 = sadd.s32 1, %s471_s12   ;;  %s47_s24 = sadd.s32 1, %s467_s11 }
   0xf   : > { %s700_s17 = scalar_select %p531_p8, 1, 0 }
  0x10   : > { %p294_p10 = pneg %p531_p8  ;;  %s44_s22 = ssub.s32 %s471_s12, %s539_s20 }
  0x11   : > { %p549_p12 = scmp.eq.s32.totalorder %s44_s22, 0  ;;  %s343_s27 = scalar_lea.hbm %s692_s0, 128 }
  0x12   : > { %p543_p11 = pnand %p294_p10, %p695_p1  ;;  %p344_p0 = scmp.ne.s32.totalorder %s692_s0, %s343_s27 }
  0x13   : > { %s702_s23 = scalar_select %p549_p12, 1, 0 }
  0x14   : > { %p345_p3 = pneg %p543_p11  ;;  %p350_p10 = scmp.lt.u32.totalorder %s343_s27, %s692_s0 }
  0x16   : > { %p346_p5 = pnand %p345_p3, %p344_p0 }
  0x18   : > { %p347_p7 = pneg %p346_p5 }
  0x1a   : > { %p352_p9 = pnand %p350_p10, %p347_p7 }
  0x1c   : > { %355 = shalt.err (!%p352_p9)
}
  0x1d   : > { %s356_s4 = scalar_lea.vmem %s111_s19, 128  ;;  %p364_p6 = scmp.lt.s32.totalorder %s111_s19, %s111_s19 }
  0x1e   : > { %p357_p1 = scmp.ne.s32.totalorder %s111_s19, %s356_s4  ;;  %p365_p4 = scmp.lt.s32.totalorder %s356_s4, %s356_s4 }
  0x20   : > { %p359_p2 = pnand %p357_p1, %p345_p3  ;;  %p366_p8 = por %p365_p4, %p364_p6 }
  0x22   : > { %p360_p13 = pneg %p359_p2 }
  0x24   : > { %p367_p12 = pnand %p366_p8, %p360_p13 }
  0x26   : > { %370 = shalt.err (!%p367_p12)
}
  0x27   : > { %297 = dma.hbm_to_vmem [thread:$0]  (!%p543_p11), %s692_s0, 128, %s111_s19, [#allocation3]  }
  0x28   : > { %p703_p1 = scmp.ne.s32.totalorder %s702_s23, 0  ;;  %p55_p2 = scmp.eq.s32.totalorder %s471_s12, 0 }
  0x29   : > { %p704_p4 = scmp.ne.s32.totalorder %s467_s11, %s463_s10  ;;  %p705_p6 = scmp.eq.s32.totalorder %s512_s13, 1 }
  0x2a   : > { %s575_s7 = scalar_select %p703_p1, %s467_s11, %s47_s24  }
  0x2b   : > { %p583_p8 = por %p705_p6, %p704_p4  ;;  %p307_p9 = scmp.lt.s32.totalorder %s471_s12, 2 }
  0x2c   : > { %s121_s14 = sand.u32 1, %s467_s11   ;;  %p707_p12 = pmov %p704_p4 }
  0x2d   : > { %s276_s18 = sshll.u32 %s121_s14, 3  ;;  %s277_s21 = sshll.u32 %s471_s12, 7 }
  0x2e   : > { %p56_p13 = por %p55_p2, %p707_p12  ;;  %s596_s19 = scalar_lea.hbm %s693_s1, %s277_s21 }
  0x2f   : > { %s125_s23 = scalar_lea.vmem [#allocation5], %s276_s18  ;;  %s122_s27 = scalar_lea.sflag [#allocation6], %s121_s14 }
  0x30   : > { %s132_s24 = sshll.u32 %s125_s23, 4  ;;  %p598_p11 = pnand %p307_p9, %p56_p13  ;;  %s602_s24 = int_to_ptr.vmem [resolvable:$true] %s132_s24 }
  0x31   : > { %s371_s28 = scalar_lea.hbm %s596_s19, 128  ;;  %s376_s3 = scalar_lea.hbm %s693_s1, 256 }
  0x32   : > { %p372_p0 = scmp.ne.s32.totalorder %s596_s19, %s371_s28  ;;  %p373_p3 = pneg %p598_p11 }
  0x33   : > { %p377_p10 = scmp.lt.u32.totalorder %s596_s19, %s693_s1  ;;  %p378_p1 = scmp.lt.u32.totalorder %s376_s3, %s371_s28 }
  0x34   : > { %p374_p5 = pnand %p373_p3, %p372_p0  ;;  %p380_p4 = scmp.lt.u32.totalorder %s371_s28, %s596_s19 }
  0x35   : > { %p379_p2 = por %p378_p1, %p377_p10 }
  0x36   : > { %p375_p7 = pneg %p374_p5 }
  0x37   : > { %p381_p6 = por %p380_p4, %p379_p2 }
  0x39   : > { %p382_p9 = pnand %p381_p6, %p375_p7 }
  0x3b   : > { %385 = shalt.err (!%p382_p9)
}
  0x3c   : > { %s386_s6 = scalar_lea.vmem %s602_s24, 128  ;;  %s474_s14 = smov [#allocation5]  }
  0x3d   : > { %p387_p12 = scmp.ne.s32.totalorder %s602_s24, %s386_s6  ;;  %s391_s18 = sshll.u32 %s474_s14, 4  ;;  %s392_s18 = int_to_ptr.vmem [resolvable:$false] %s391_s18 }
  0x3e   : > { %s393_s21 = scalar_lea.vmem %s392_s18, 256  ;;  %p394_p5 = scmp.lt.s32.totalorder %s602_s24, %s392_s18 }
  0x3f   : > { %p389_p13 = pnand %p387_p12, %p373_p3  ;;  %p395_p10 = scmp.lt.s32.totalorder %s393_s21, %s386_s6 }
  0x41   : > { %p390_p0 = pneg %p389_p13  ;;  %p396_p1 = por %p395_p10, %p394_p5 }
  0x43   : > { %p397_p2 = pnand %p396_p1, %p390_p0 }
  0x45   : > { %400 = shalt.err (!%p397_p2)
}
  0x46   : > { %301 = dma.hbm_to_vmem [thread:$0]  (!%p598_p11), %s596_s19, 128, %s602_s24, %s122_s27  }
  0x47   : > { %p709_p7 = scmp.ne.s32.totalorder %s700_s17, 0 }
  0x48   : > { %p710_p3 = scmp.eq.s32.totalorder (!%p709_p7), %s512_s13, 0 }
  0x49   : > { %141 = sbr.rel (%p709_p7) target bundleno = 110 (0x6e), region = 28 }
  0x50   : > { %446 = dma.done.wait (%p710_p3), [#allocation3], 128   ;;  %p711_p4 = pmov %p710_p3 }
  0x51   : > { %s636_s22 = sand.u32 1, %s463_s10   ;;  %p712_p6 = scmp.ne.s32.totalorder %s698_s15, 0 }
  0x52   : > { %448 = vsyncadd (%p711_p4), [#allocation3], 4294967168  ;;  %s280_s25 = sshll.u32 %s636_s22, 3  ;;  %s148_s23 = scalar_lea.sflag [#allocation6], %s636_s22 }
  0x53   : > { %s151_s26 = scalar_lea.vmem [#allocation5], %s280_s25 }
  0x54   : > { %450 = dma.done.wait (%p712_p6), %s148_s23, 128  }
  0x55   : > { %452 = vsyncadd (%p712_p6), %s148_s23, 4294967168  ;;  %s171_s17 = scalar_lea.vmem [#allocation7], %s280_s25  ;;  %s283_s24 = sshll.u32 %s512_s13, 7  ;;  %v172_v0 = vld [vmem:[%s151_s26] sm:$0xff]  ;;  %v173_v1 = vld [vmem:[#allocation2] sm:$0xff] }
  0x56   : > { %s190_s19 = sshll.u32 %s171_s17, 4  ;;  %v174_v2 = vadd.f32 %v173_v1, %v172_v0  ;;  %s650_s29 = scalar_lea.hbm %s694_s2, %s283_s24  ;;  %s645_s19 = int_to_ptr.vmem [resolvable:$true] %s190_s19 }
  0x57   : > { %s177_s15 = scalar_lea.sflag [#allocation4], %s636_s22  ;;  %s401_s30 = scalar_lea.vmem %s645_s19, 128 }
  0x58   : > { %175 = vst [vmem:[%s171_s17] sm:$0xff] %v174_v2  ;;  %p402_p11 = scmp.ne.s32.totalorder %s645_s19, %s401_s30  ;;  %s475_s13 = smov [#allocation7]  }
  0x59   : > { %s405_s3 = sshll.u32 %s475_s13, 4  ;;  %s406_s3 = int_to_ptr.vmem [resolvable:$false] %s405_s3 }
  0x5a   : > { %p403_p9 = pnand %p402_p11, %p583_p8  ;;  %s407_s4 = scalar_lea.vmem %s406_s3, 256 }
  0x5b   : > { %p408_p13 = scmp.lt.s32.totalorder %s645_s19, %s406_s3  ;;  %p409_p0 = scmp.lt.s32.totalorder %s407_s4, %s401_s30 }
  0x5c   : > { %p404_p12 = pneg %p403_p9 }
  0x5d   : > { %p410_p5 = por %p409_p0, %p408_p13 }
  0x5f   : > { %p411_p10 = pnand %p410_p5, %p404_p12 }
  0x61   : > { %414 = shalt.err (!%p411_p10)
}
  0x62   : > { %s415_s5 = scalar_lea.hbm %s650_s29, 128  ;;  %s419_s18 = scalar_lea.hbm %s694_s2, 256 }
  0x63   : > { %p416_p1 = scmp.ne.s32.totalorder %s650_s29, %s415_s5  ;;  %p420_p3 = scmp.lt.u32.totalorder %s650_s29, %s694_s2 }
  0x64   : > { %p421_p4 = scmp.lt.u32.totalorder %s419_s18, %s415_s5  ;;  %p423_p11 = scmp.lt.u32.totalorder %s415_s5, %s650_s29 }
  0x65   : > { %p417_p2 = pnand %p416_p1, %p583_p8 }
  0x66   : > { %p422_p6 = por %p421_p4, %p420_p3 }
  0x67   : > { %p418_p7 = pneg %p417_p2 }
  0x68   : > { %p424_p9 = por %p423_p11, %p422_p6 }
  0x6a   : > { %p425_p12 = pnand %p424_p9, %p418_p7 }
  0x6c   : > { %428 = shalt.err (!%p425_p12)
}
  0x6d   : > { %292 = dma.vmem_to_hbm [thread:$0]  (%p583_p8), %s645_s19, 128, %s650_s29, %s177_s15  }
  0x6e PF: > { %s202_s25 = sand.u32 1, %s459_s9   ;;  %p713_p13 = scmp.ne.s32.totalorder %s699_s16, 0 }
  0x6f   : > { %p714_p0 = scmp.ge.s32.totalorder %s471_s12, 2  ;;  %s203_s23 = scalar_lea.sflag [#allocation4], %s202_s25 }
  0x71   : > { %p303_p5 = pnand %p714_p0, %p713_p13 }
  0x73   : > { %454 = dma.done.wait (!%p303_p5), %s203_s23, 128  }
  0x74   : > { %456 = vsyncadd (!%p303_p5), %s203_s23, 4294967168  ;;  %p16_p10 = scmp.ge.s32.totalorder %s539_s20, 4   ;;  %s715_s9 = smov %s463_s10 }
  0x75   : > { %s716_s10 = smov %s467_s11  ;;  %s717_s11 = smov %s575_s7 }
  0x76   : > { %s718_s12 = smov %s539_s20  ;;  %18 = sbr.rel (!%p16_p10) target bundleno = 6 (0x6), region = 78 }
  0x7d   :  { %208 = vsyncpa [#allocation3], 1 }
  0x7e   :  { %210 = vsyncpa [#allocation3 + $0x1], 1 }
  0x7f   :  { %211 = vsyncpa [#allocation6], 1 }
  0x80   :  { %213 = vsyncpa [#allocation6 + $0x1], 1 }
  0x81   :  { %214 = vsyncpa [#allocation4], 1 }
  0x82   :  { %216 = vsyncpa [#allocation4 + $0x1], 1 }

// kernel: global_filter_1d.3
= control target key start
LH: loop header
LB: loop body
LE: loop exit
PB: predicated region body
PF: predicated region fallthrough
CT: control target
= control target key end

     0   :  { %7 = vsyncpa [#allocation3], 0  ;;  %s467_s0 = inlined_call_operand.vmem [shape: f32[16,128], index: 0, kind: input, shape index: {}]   ;;  %s468_s1 = inlined_call_operand.vmem [shape: f32[2,8,1], index: 1, kind: input, shape index: {}]   ;;  %s469_s2 = inlined_call_operand.hbm [shape: f32[16,16], index: 2, kind: output, shape index: {}]  }
   0x1   :  { %9 = vsyncpa [#allocation3 + $0x1], 0  ;;  %s361_s9 = smov 0   ;;  %s363_s10 = smov 0  }
   0x2   :  { %s365_s11 = smov 0   ;;  %s367_s12 = smov 0  }
   0x3 LB: > { %s382_s13 = sadd.s32 4294967295, %s342_s12   ;;  %s229_s14 = sadd.s32 4294967294, %s342_s12   ;;  %s342_s12 = sphi %s367_s12, %s475_s12   ;;  %s338_s11 = sphi %s365_s11, %s474_s11   ;;  %s334_s10 = sphi %s363_s10, %s473_s10   ;;  %s330_s9 = sphi %s361_s9, %s472_s9  }
   0x4   : > { %s386_s15 = sadd.s32 1, %s342_s12   ;;  %s69_s16 = sadd.s32 1, %s338_s11 }
   0x5   : > { %s66_s17 = ssub.s32 %s342_s12, %s386_s15  ;;  %p79_p0 = scmp.ne.s32.totalorder %s338_s11, %s334_s10 }
   0x6   : > { %p67_p1 = scmp.eq.s32.totalorder %s66_s17, 0  ;;  %p80_p2 = scmp.eq.s32.totalorder %s382_s13, 1 }
   0x7   : > { %p85_p3 = scmp.ne.s32.totalorder %s334_s10, %s330_s9  ;;  %p86_p4 = scmp.eq.s32.totalorder %s229_s14, 1 }
   0x8   : > { %s397_s18 = scalar_select %p67_p1, %s338_s11, %s69_s16  }
   0x9   : > { %p399_p5 = por %p80_p2, %p79_p0  ;;  %p403_p6 = por %p86_p4, %p85_p3 }
   0xa   : > { %p232_p7 = scmp.ge.s32.totalorder %s342_s12, 1  ;;  %p114_p8 = scmp.lt.s32.totalorder %s342_s12, 3 }
   0xc   : > { %p115_p9 = pnand %p232_p7, %p114_p8 }
   0xd   : > { %v139_v0 = vld [vmem:[%s468_s1] sm:$0xff] (!%p115_p9)  ;;  %v344_v1 = vmov (!%p115_p9), 0   ;;  %v140_v2 = vld [vmem:[%s468_s1 + $0x8] sm:$0xff] (!%p115_p9)  ;;  %p135_p10 = scmp.lt.s32.totalorder (!%p115_p9), %s382_s13, 1  ;;  %s132_s26 = sand.u32 (!%p115_p9), 1, %s334_s10   ;;  %vm154_vm0 = vcmask (!%p115_p9), 130048  }
   0xe   : > { %118 = sbr.rel (%p115_p9) target bundleno = 163 (0xa3), region = 28  ;;  %279 = vset.pattern.permute.xlu0 (!%p115_p9), %v344_v1  ;;  %s233_s28 = sshll.u32 (!%p115_p9), %s132_s26, 3 }
   0xf   : > { %144 = vperm.xlu0 (!%p115_p9), %279, %v139_v0   ;;  %s236_s4 = sshll.u32 (!%p115_p9), %s382_s13, 7  ;;  %s134_s5 = scalar_lea.vmem (!%p115_p9), [#allocation2], %s233_s28 }
  0x10   : > { %s170_s6 = sshll.u32 (!%p115_p9), %s134_s5, 4  ;;  %s425_s14 = scalar_lea.hbm (!%p115_p9), %s469_s2, %s236_s4  ;;  %s427_s6 = int_to_ptr.vmem [resolvable:$true] %s170_s6 }
  0x11   : > { %s157_s16 = scalar_lea.sflag (!%p115_p9), [#allocation3], %s132_s26  ;;  %s280_s17 = scalar_lea.vmem (!%p115_p9), %s427_s6, 128 }
  0x12   : > { %p281_p11 = scmp.ne.s32.totalorder (!%p115_p9), %s427_s6, %s280_s17 }
  0x13   : > { %150 = vperm.xlu0 (!%p115_p9), %279, %v140_v2  }
  0x14   : > { %p282_p12 = pnand (!%p115_p9), %p281_p11, %p399_p5 }
  0x15   : > { %s136_s25 = scalar_select %p135_p10, %s382_s13, 1 }
  0x16   : > { %p283_p13 = pneg %p282_p12  ;;  %s345_s13 = smov [#allocation2]  }
  0x17   : > { %s234_s27 = sshll.u32 %s136_s25, 3  ;;  %s284_s21 = sshll.u32 %s345_s13, 4  ;;  %s285_s21 = int_to_ptr.vmem [resolvable:$false] %s284_s21 }
  0x18   : > { %s138_s3 = scalar_lea.vmem %s467_s0, %s234_s27  ;;  %s286_s22 = scalar_lea.vmem %s285_s21, 256 }
  0x19   : > { %v141_v4 = vld [vmem:[%s138_s3] sm:$0xff]  ;;  %p287_p0 = scmp.lt.s32.totalorder %s427_s6, %s285_s21  ;;  %p288_p1 = scmp.lt.s32.totalorder %s286_s22, %s280_s17 }
  0x1b   : > { %p289_p2 = por %p288_p1, %p287_p0 }
  0x1d   : > { %p290_p3 = pnand %p289_p2, %p283_p13 }
  0x8e   : > { %v145_v3 = vpop.permute.xlu0 %144 }
  0x8f   : > { %v147_v5 = vmul.f32 %v145_v3, %v141_v4 }
  0x92   : > { %v151_v6 = vpop.permute.xlu0 %150 }
  0x93   : > { %v153_v7 = vadd.f32 %v151_v6, %v147_v5 }
  0x95   : > { %155 = vst.msk [vmem:[%s134_s5] sm:$0xff] %vm154_vm0, %v153_v7 }
  0x96   : > { %293 = shalt.err (!%p290_p3)
}
  0x97   : > { %s294_s23 = scalar_lea.hbm %s425_s14, 128  ;;  %s298_s26 = scalar_lea.hbm %s469_s2, 256 }
  0x98   : > { %p295_p4 = scmp.ne.s32.totalorder %s425_s14, %s294_s23  ;;  %p299_p9 = scmp.lt.u32.totalorder %s425_s14, %s469_s2 }
  0x99   : > { %p300_p10 = scmp.lt.u32.totalorder %s298_s26, %s294_s23  ;;  %p302_p12 = scmp.lt.u32.totalorder %s294_s23, %s425_s14 }
  0x9a   : > { %p296_p7 = pnand %p295_p4, %p399_p5 }
  0x9b   : > { %p301_p11 = por %p300_p10, %p299_p9 }
  0x9c   : > { %p297_p8 = pneg %p296_p7 }
  0x9d   : > { %p303_p13 = por %p302_p12, %p301_p11 }
  0x9f   : > { %p304_p0 = pnand %p303_p13, %p297_p8 }
  0xa1   : > { %307 = shalt.err (!%p304_p0)
}
  0xa2   : > { %239 = dma.vmem_to_hbm [thread:$0]  (%p399_p5), %s427_s6, 128, %s425_s14, %s157_s16  }
  0xa3 PF: > { %p245_p1 = scmp.ge.s32.totalorder %s342_s12, 2  ;;  %s182_s29 = sand.u32 1, %s330_s9  }
  0xa4   : > { %s183_s30 = scalar_lea.sflag [#allocation3], %s182_s29 }
  0xa5   : > { %p242_p2 = pnand %p245_p1, %p403_p6 }
  0xa7   : > { %325 = dma.done.wait (!%p242_p2), %s183_s30, 128  }
  0xa8   : > { %327 = vsyncadd (!%p242_p2), %s183_s30, 4294967168  ;;  %p12_p3 = scmp.ge.s32.totalorder %s386_s15, 4   ;;  %s472_s9 = smov %s334_s10 }
  0xa9   : > { %s473_s10 = smov %s338_s11  ;;  %s474_s11 = smov %s397_s18 }
  0xaa   : > { %s475_s12 = smov %s386_s15  ;;  %14 = sbr.rel (!%p12_p3) target bundleno = 3 (0x3), region = 63 }
  0xb1   :  { %188 = vsyncpa [#allocation3], 1 }
  0xb2   :  { %190 = vsyncpa [#allocation3 + $0x1], 1 }

// kernel: global_filter_1d.2
= control target key start
LH: loop header
LB: loop body
LE: loop exit
PB: predicated region body
PF: predicated region fallthrough
CT: control target
= control target key end

     0   :  { %s722_s21 = smov 0   ;;  %s880_s0 = inlined_call_operand.vmem [shape: f32[16,16], index: 0, kind: input, shape index: {}]   ;;  %s881_s1 = inlined_call_operand.vmem [shape: f32[16,256], index: 1, kind: input, shape index: {}]   ;;  %s882_s2 = inlined_call_operand.vmem [shape: f32[256,128], index: 2, kind: input, shape index: {}]   ;;  %s883_s3 = inlined_call_operand.vmem [shape: f32[3,8,256], index: 3, kind: input, shape index: {}]   ;;  %s884_s4 = inlined_call_operand.vmem [shape: f32[16,128], index: 4, kind: output, shape index: {0}]   ;;  %s885_s5 = inlined_call_operand.vmem [shape: f32[2,1,8], index: 5, kind: output, shape index: {1}]   ;;  %s886_s6 = inlined_call_operand.vmem [shape: f32[2,1,8], index: 6, kind: output, shape index: {2}]  }
   0x1 LB: > { %s588_s22 = sadd.s32 4294967295, %s684_s21   ;;  %p592_p0 = scmp.ge.s32.totalorder %s684_s21, 1  ;;  %s684_s21 = sphi %s722_s21, %s17_s21  }
   0x2   : > { %p216_p1 = scmp.lt.s32.totalorder %s684_s21, 3 }
   0x4   : > { %p217_p2 = pnand %p592_p0, %p216_p1 }
   0x5   : > { %v266_v0 = vld [vmem:[%s881_s1 + $0x8] sm:$0xff] (!%p217_p2)  ;;  %v268_v1 = vld [vmem:[%s881_s1 + $0x18] sm:$0xff] (!%p217_p2)  ;;  %v265_v2 = vld [vmem:[%s881_s1] sm:$0xff] (!%p217_p2)  ;;  %p250_p3 = scmp.lt.s32.totalorder (!%p217_p2), %s588_s22, 1  ;;  %v686_v5 = vmov (!%p217_p2), 0.0   ;;  %vm269_vm0 = vcmask (!%p217_p2), 130048  }
   0x6   : > { %220 = sbr.rel (%p217_p2) target bundleno = 601 (0x259), region = 36  ;;  %v633_v3 = vpack.c.bf16 (!%p217_p2), %v268_v1, %v266_v0  ;;  %v267_v4 = vld [vmem:[%s881_s1 + $0x10] sm:$0xff] (!%p217_p2)  ;;  %337 = vmatprep.mubr.f32.mxu0 (!%p217_p2), %v686_v5  ;;  %v374_v6 = vld [vmem:[%s882_s2 + $0x80] sm:$0xff] (!%p217_p2)  ;;  %v375_v7 = vld [vmem:[%s882_s2 + $0x88] sm:$0xff] (!%p217_p2)  ;;  %vm476_vm1 = vcmask (!%p217_p2), 57344  }
   0x7   : > { %v635_v8 = vpack.c.bf16 (!%p217_p2), %v267_v4, %v265_v2  ;;  %v637_v9 = vpack.c.bf16 (!%p217_p2), %v375_v7, %v374_v6  ;;  %v358_v10 = vld [vmem:[%s882_s2] sm:$0xff] (!%p217_p2)  ;;  %v359_v11 = vld [vmem:[%s882_s2 + $0x8] sm:$0xff] (!%p217_p2)  ;;  %v376_v12 = vld [vmem:[%s882_s2 + $0x90] sm:$0xff] (!%p217_p2) }
   0x8   : > { %634 = vmatprep.subr.bf16.mxu0 (!%p217_p2), %v633_v3  ;;  %v639_v13 = vpack.c.bf16 (!%p217_p2), %v359_v11, %v358_v10  ;;  %v377_v14 = vld [vmem:[%s882_s2 + $0x98] sm:$0xff] (!%p217_p2)  ;;  %v360_v15 = vld [vmem:[%s882_s2 + $0x10] sm:$0xff] (!%p217_p2)  ;;  %v378_v18 = vld [vmem:[%s882_s2 + $0xa0] sm:$0xff] (!%p217_p2) }
   0x9   : > { %v361_v16 = vld [vmem:[%s882_s2 + $0x18] sm:$0xff] (!%p217_p2)  ;;  %636 = vmatpush1.bf16.msra.mxu0 (!%p217_p2), %v635_v8  ;;  %638 = vmatprep.subr.bf16.mxu1 (!%p217_p2), %v637_v9  ;;  %v641_v17 = vpack.c.bf16 (!%p217_p2), %v377_v14, %v376_v12  ;;  %v379_v19 = vld [vmem:[%s882_s2 + $0xa8] sm:$0xff] (!%p217_p2)  ;;  %v362_v23 = vld [vmem:[%s882_s2 + $0x20] sm:$0xff] (!%p217_p2)  ;;  %v469_v12 = vlaneseq (!%p217_p2) }
   0xa   : > { %640 = vmatpush3.bf16.msra.mxu1 (!%p217_p2), %v639_v13  ;;  %v643_v20 = vpack.c.bf16 (!%p217_p2), %v361_v16, %v360_v15  ;;  %v645_v22 = vpack.c.bf16 (!%p217_p2), %v379_v19, %v378_v18  ;;  %v363_v24 = vld [vmem:[%s882_s2 + $0x28] sm:$0xff] (!%p217_p2)  ;;  %v380_v25 = vld [vmem:[%s882_s2 + $0xb0] sm:$0xff] (!%p217_p2)  ;;  %v381_v26 = vld [vmem:[%s882_s2 + $0xb8] sm:$0xff] (!%p217_p2) }
   0xb   : > { %642 = vmatprep.subr.bf16.mxu1 (!%p217_p2), %v641_v17  ;;  %v647_v27 = vpack.c.bf16 (!%p217_p2), %v363_v24, %v362_v23  ;;  %v649_v28 = vpack.c.bf16 (!%p217_p2), %v381_v26, %v380_v25  ;;  %v364_v29 = vld [vmem:[%s882_s2 + $0x30] sm:$0xff] (!%p217_p2)  ;;  %v365_v30 = vld [vmem:[%s882_s2 + $0x38] sm:$0xff] (!%p217_p2)  ;;  %v382_v31 = vld [vmem:[%s882_s2 + $0xc0] sm:$0xff] (!%p217_p2)  ;;  %v470_v13 = vand.u32 (!%p217_p2), 127, %v469_v12  ;;  %v472_v14 = vshrl.u32 (!%p217_p2), %v469_v12, 7 }
   0xc   : > { %v383_v32 = vld [vmem:[%s882_s2 + $0xc8] sm:$0xff] (!%p217_p2)  ;;  %v651_v33 = vpack.c.bf16 (!%p217_p2), %v365_v30, %v364_v29  ;;  %v366_v35 = vld [vmem:[%s882_s2 + $0x40] sm:$0xff] (!%p217_p2)  ;;  %v384_v37 = vld [vmem:[%s882_s2 + $0xd0] sm:$0xff] (!%p217_p2) }
   0xd   : > { %s888_s22 = smov (!%p250_p3, %s588_s22), 1  ;;  %v653_v34 = vpack.c.bf16 %v383_v32, %v382_v31  ;;  %v367_v36 = vld [vmem:[%s882_s2 + $0x48] sm:$0xff]  ;;  %v385_v38 = vld [vmem:[%s882_s2 + $0xd8] sm:$0xff]  ;;  %v368_v41 = vld [vmem:[%s882_s2 + $0x50] sm:$0xff]  ;;  %v473_v15 = vsub.s32 %v470_v13, %v472_v14 }
   0xe   : > { %s593_s25 = sshll.u32 %s888_s22, 3  ;;  %644 = vmatpush3.bf16.msra.mxu1 %v643_v20  ;;  %v655_v39 = vpack.c.bf16 %v367_v36, %v366_v35  ;;  %v657_v40 = vpack.c.bf16 %v385_v38, %v384_v37  ;;  %v369_v42 = vld [vmem:[%s882_s2 + $0x58] sm:$0xff]  ;;  %v386_v44 = vld [vmem:[%s882_s2 + $0xe0] sm:$0xff]  ;;  %v387_v45 = vld [vmem:[%s882_s2 + $0xe8] sm:$0xff]  ;;  %s260_s7 = scalar_lea.vmem %s885_s5, %s888_s22 }
   0xf   : > { %s253_s8 = scalar_lea.vmem %s880_s0, %s593_s25  ;;  %646 = vmatprep.subr.bf16.mxu1 %v645_v22  ;;  %v659_v43 = vpack.c.bf16 %v369_v42, %v368_v41  ;;  %v661_v46 = vpack.c.bf16 %v387_v45, %v386_v44  ;;  %v370_v47 = vld [vmem:[%s882_s2 + $0x60] sm:$0xff]  ;;  %v371_v48 = vld [vmem:[%s882_s2 + $0x68] sm:$0xff]  ;;  %v388_v50 = vld [vmem:[%s882_s2 + $0xf0] sm:$0xff]  ;;  %s257_s28 = scalar_lea.vmem %s884_s4, %s593_s25 }
  0x10   : > { %v264_v21 = vld [vmem:[%s253_s8] sm:$0xff]  ;;  %v663_v49 = vpack.c.bf16 %v371_v48, %v370_v47  ;;  %v389_v51 = vld [vmem:[%s882_s2 + $0xf8] sm:$0xff]  ;;  %v372_v53 = vld [vmem:[%s882_s2 + $0x70] sm:$0xff]  ;;  %s263_s9 = scalar_lea.vmem %s886_s6, %s888_s22 }
  0x11   : > { %595 = vmatmul.mubr.msk.f32.vlgmr.msra.gmra.mrb[0].mxu0 %vm269_vm0, %v264_v21  ;;  %v665_v52 = vpack.c.bf16 %v389_v51, %v388_v50  ;;  %v373_v54 = vld [vmem:[%s882_s2 + $0x78] sm:$0xff]  ;;  %v344_v56 = vld [vmem:[%s883_s3] sm:$0xff]  ;;  %v345_v58 = vld [vmem:[%s883_s3 + $0x8] sm:$0xff] }
  0x12   : > { %648 = vmatpush3.bf16.msra.mxu1 %v647_v27  ;;  %v667_v55 = vpack.c.bf16 %v373_v54, %v372_v53  ;;  %v347_v57 = vld [vmem:[%s883_s3 + $0x18] sm:$0xff]  ;;  %v346_v59 = vld [vmem:[%s883_s3 + $0x10] sm:$0xff]  ;;  %v349_v2 = vld [vmem:[%s883_s3 + $0x28] sm:$0xff] }
  0x13   : > { %650 = vmatprep.subr.bf16.mxu1 %v649_v28  ;;  %v348_v3 = vld [vmem:[%s883_s3 + $0x20] sm:$0xff] }
  0x16   : > { %652 = vmatpush3.bf16.msra.mxu1 %v651_v33 }
  0x17   : > { %654 = vmatprep.subr.bf16.mxu1 %v653_v34 }
  0x1a   : > { %656 = vmatpush3.bf16.msra.mxu1 %v655_v39 }
  0x1b   : > { %658 = vmatprep.subr.bf16.mxu1 %v657_v40 }
  0x1e   : > { %660 = vmatpush3.bf16.msra.mxu1 %v659_v43 }
  0x1f   : > { %662 = vmatprep.subr.bf16.mxu1 %v661_v46 }
  0x22   : > { %664 = vmatpush3.bf16.msra.mxu1 %v663_v49 }
  0x23   : > { %666 = vmatprep.subr.bf16.mxu1 %v665_v52 }
  0x26   : > { %668 = vmatpush3.bf16.msra.mxu1 %v667_v55 }
  0xe4   : > { %v339_v60 = vpop.f32.mrb[0].mxu0 }
  0xe5   : > { %v350_v61 = vmul.f32 %v344_v56, %v339_v60  ;;  %v353_v62 = vmul.f32 %v347_v57, %v339_v60  ;;  %v341_v63 = vpop.f32.mrb[1].mxu0 }
  0xe6   : > { %v351_v0 = vmul.f32 %v345_v58, %v341_v63  ;;  %v352_v1 = vmul.f32 %v346_v59, %v341_v63 }
  0xe8   : > { %v354_v4 = vadd.f32 %v352_v1, %v350_v61  ;;  %v355_v5 = vadd.f32 %v353_v62, %v351_v0 }
  0xea   : > { %v357_v6 = vadd.f32 %v355_v5, %v349_v2  ;;  %v356_v7 = vadd.f32 %v354_v4, %v348_v3 }
  0xec   : > { %454 = vmatprep.mubr.f32.mxu1 %v357_v6 }
  0xed   : > { %455 = vmatmul.mubr.f32.vlgmr.msra.gmra.mrb[0].mxu1 %v356_v7 }
 0x1c0   : > { %v630_v8 = vpop.f32.mrb[0].mxu1 }
 0x1c1   : > { %v631_v9 = vpop.f32.mrb[1].mxu1 }
 0x1c2   : > { %v632_v10 = vadd.f32 %v631_v9, %v630_v8 }
 0x1c4   : > { %460 = vst [vmem:[%s257_s28] sm:$0xff] %v632_v10  ;;  %461 = vadd.xlane.f32.xlu0 %v632_v10  ;;  %v464_v11 = vmul.f32 %v632_v10, %v632_v10 }
 0x1c8   : > { %465 = vadd.xlane.f32.xlu0 %v464_v11 }
 0x251   : > { %v462_v16 = vpop.xlane.xlu0 %461 }
 0x252   : > { %v474_v17 = vrot.slane %v462_v16, %v473_v15 }
 0x254   : > { %477 = vst.msk [vmem:[%s260_s7] sm:$0x1] %vm476_vm1, %v474_v17 }
 0x255   : > { %v466_v18 = vpop.xlane.xlu0 %465 }
 0x256   : > { %v482_v19 = vrot.slane %v466_v18, %v473_v15 }
 0x258   : > { %484 = vst.msk [vmem:[%s263_s9] sm:$0x1] %vm476_vm1, %v482_v19 }
 0x259 PF: > { %s17_s21 = sadd.s32 1, %s684_s21  }
 0x25a   : > { %p14_p4 = scmp.ge.s32.totalorder %s17_s21, 4  }
 0x25c   :  { %16 = sbr.rel (!%p14_p4) target bundleno = 1 (0x1), region = 90 }

</bundles_post_ra>
